<compile_context>
chip_gen: v6e
topology: v6e:2x2x1
jax: 0.10.0
libtpu: 0.0.40
codegen_flags: <defaults>
</compile_context>

<pallas_src>
import jax
import jax.numpy as jnp
from jax.experimental import pallas as pl
from jax.experimental.pallas import tpu as pltpu

_LANES = 128


def _affine_kernel(w_ref, c_ref, x_ref, o_ref):
    # w_ref: SMEM (2,)  fused weight
    # c_ref: SMEM (1,)  fused bias
    # x_ref: VMEM (2, tile_rows, 128)  -- feature-major, batch on (rows, lanes)
    # o_ref: VMEM (tile_rows, 128)
    o_ref[...] = x_ref[0] * w_ref[0] + x_ref[1] * w_ref[1] + c_ref[0]


def circle1_forward(x, w1, b1, w2, b2, *, tile_rows=1024):
    """x: (N, 2) float32.  Returns (N, 1) float32.

    Equivalent to (x @ w1 + b1) @ w2 + b2 (exact fusion: no nonlinearity).
    """
    n = x.shape[0]

    # ---- Fuse the two linear layers in the wrapper (exact) ----------------
    w = (w1 @ w2).reshape(2).astype(jnp.float32)          # (2,)
    c = (b1 @ w2 + b2).reshape(1).astype(jnp.float32)     # (1,)

    # ---- Lane-dense layout: batch -> (rows, 128) slabs --------------------
    rows = pl.cdiv(n, _LANES)
    tr = min(tile_rows, 8 * pl.cdiv(rows, 8))              # tile rows, mult of 8
    rows_pad = pl.cdiv(rows, tr) * tr
    n_pad = rows_pad * _LANES

    x_pad = jnp.pad(x.astype(jnp.float32), ((0, n_pad - n), (0, 0)))
    # (n_pad, 2) -> (2, rows_pad, 128): feature-major, batch spans sublanes+lanes.
    xt = x_pad.T.reshape(2, rows_pad, _LANES)

    grid = (rows_pad // tr,)

    out = pl.pallas_call(
        _affine_kernel,
        out_shape=jax.ShapeDtypeStruct((rows_pad, _LANES), jnp.float32),
        grid=grid,
        in_specs=[
            pl.BlockSpec(memory_space=pltpu.SMEM),                 # w (2,)
            pl.BlockSpec(memory_space=pltpu.SMEM),                 # c (1,)
            pl.BlockSpec((2, tr, _LANES), lambda i: (0, i, 0)),    # x tile
        ],
        out_specs=pl.BlockSpec((tr, _LANES), lambda i: (i, 0)),
        compiler_params=pltpu.CompilerParams(
            dimension_semantics=("parallel",)),
        cost_estimate=pl.CostEstimate(
            flops=4 * n_pad, transcendentals=0, bytes_accessed=12 * n_pad),
    )(w, c, xt)

    # Undo the layout plumbing: (rows_pad, 128) -> (N, 1)
    return out.reshape(n_pad, 1)[:n]


def init_params(key):
    """Linear(2, 5): W1 (2, 5), b1 (1, 5);  Linear(5, 1): W2 (5, 1), b2 (1, 1).
    PyTorch default init: U(-1/sqrt(fan_in), 1/sqrt(fan_in))."""
    k1, k2, k3, k4 = jax.random.split(key, 4)
    lim1 = 1.0 / jnp.sqrt(2.0)
    lim2 = 1.0 / jnp.sqrt(5.0)
    w1 = jax.random.uniform(k1, (2, 5), jnp.float32, -lim1, lim1)
    b1 = jax.random.uniform(k2, (1, 5), jnp.float32, -lim1, lim1)
    w2 = jax.random.uniform(k3, (5, 1), jnp.float32, -lim2, lim2)
    b2 = jax.random.uniform(k4, (1, 1), jnp.float32, -lim2, lim2)
    return w1, b1, w2, b2


if __name__ == "__main__":
    key = jax.random.PRNGKey(0)
    k_x, k_x2, k_p = jax.random.split(key, 3)

    w1, b1, w2, b2 = init_params(k_p)

    # Case 1: small batch (single grid step).
    n1 = 64
    x1 = jax.random.uniform(k_x, (n1, 2), jnp.float32)
    out1 = jax.block_until_ready(circle1_forward(x1, w1, b1, w2, b2))
    ref1 = (x1 @ w1 + b1) @ w2 + b2
    assert out1.shape == (n1, 1)
    assert jnp.allclose(out1, ref1, atol=1e-5, rtol=1e-5)

    # Case 2: non-multiple-of-128 batch with a small tile to exercise a
    # multi-step, double-buffered grid (5 steps).
    n2 = 5000
    x2 = jax.random.uniform(k_x2, (n2, 2), jnp.float32)
    out2 = jax.block_until_ready(
        circle1_forward(x2, w1, b1, w2, b2, tile_rows=8))
    ref2 = (x2 @ w1 + b1) @ w2 + b2
    assert out2.shape == (n2, 1)
    assert jnp.allclose(out2, ref2, atol=1e-5, rtol=1e-5)

    print("KERNEL_OK")
</pallas_src>

<mosaic_0001>
module attributes {stable_mosaic.version = 11 : i64} {
  func.func @_affine_kernel(%arg0: i32, %arg1: memref<2xf32, #tpu.memory_space<smem>>, %arg2: memref<1xf32, #tpu.memory_space<smem>>, %arg3: memref<2x8x128xf32, #tpu.memory_space<vmem>>, %arg4: memref<8x128xf32, #tpu.memory_space<vmem>>) attributes {dimension_semantics = [#tpu.dimension_semantics<parallel>], iteration_bounds = array<i64: 1>, scalar_prefetch = 0 : i64, scratch_operands = 0 : i64, tpu.core_type = #tpu.core_type<tc>, window_params = [{transform_indices = @transform_0, window_bounds = array<i64: 2>}, {transform_indices = @transform_1, window_bounds = array<i64: 1>}, {transform_indices = @transform_2, window_bounds = array<i64: 2, 8, 128>}, {transform_indices = @transform_3, window_bounds = array<i64: 8, 128>}]} {
    %c0 = arith.constant 0 : index
    %c0_0 = arith.constant 0 : index
    %c0_1 = arith.constant 0 : index
    %0 = vector.load %arg3[%c0, %c0_0, %c0_1] : memref<2x8x128xf32, #tpu.memory_space<vmem>>, vector<1x8x128xf32>
    %1 = vector.shape_cast %0 : vector<1x8x128xf32> to vector<8x128xf32>
    %c0_2 = arith.constant 0 : index
    %2 = memref.load %arg1[%c0_2] : memref<2xf32, #tpu.memory_space<smem>>
    %3 = vector.broadcast %2 : f32 to vector<8x128xf32>
    %4 = arith.mulf %1, %3 : vector<8x128xf32>
    %c1 = arith.constant 1 : index
    %c0_3 = arith.constant 0 : index
    %c0_4 = arith.constant 0 : index
    %5 = vector.load %arg3[%c1, %c0_3, %c0_4] : memref<2x8x128xf32, #tpu.memory_space<vmem>>, vector<1x8x128xf32>
    %6 = vector.shape_cast %5 : vector<1x8x128xf32> to vector<8x128xf32>
    %c1_5 = arith.constant 1 : index
    %7 = memref.load %arg1[%c1_5] : memref<2xf32, #tpu.memory_space<smem>>
    %8 = vector.broadcast %7 : f32 to vector<8x128xf32>
    %9 = arith.mulf %6, %8 : vector<8x128xf32>
    %10 = arith.addf %4, %9 : vector<8x128xf32>
    %c0_6 = arith.constant 0 : index
    %11 = memref.load %arg2[%c0_6] : memref<1xf32, #tpu.memory_space<smem>>
    %12 = vector.broadcast %11 : f32 to vector<8x128xf32>
    %13 = arith.addf %10, %12 : vector<8x128xf32>
    %c0_7 = arith.constant 0 : index
    %c0_8 = arith.constant 0 : index
    %14 = vector.load %arg4[%c0_7, %c0_8] : memref<8x128xf32, #tpu.memory_space<vmem>>, vector<8x128xf32>
    tpu.vector_store %arg4[%c0_7, %c0_8], %13 {strides = array<i32>} : memref<8x128xf32, #tpu.memory_space<vmem>>, vector<8x128xf32>,
    return
  }
  func.func @transform_0(%arg0: i32) -> i32 {
    %c0_i32 = arith.constant 0 : i32
    %c0_i32_0 = arith.constant 0 : i32
    return %c0_i32 : i32
  }
  func.func @transform_1(%arg0: i32) -> i32 {
    %c0_i32 = arith.constant 0 : i32
    %c0_i32_0 = arith.constant 0 : i32
    return %c0_i32 : i32
  }
  func.func @transform_2(%arg0: i32) -> (i32, i32, i32) {
    %c0_i32 = arith.constant 0 : i32
    %c0_i32_0 = arith.constant 0 : i32
    %c0_i32_1 = arith.constant 0 : i32
    return %c0_i32, %arg0, %c0_i32_0 : i32, i32, i32
  }
  func.func @transform_3(%arg0: i32) -> (i32, i32) {
    %c0_i32 = arith.constant 0 : i32
    %c0_i32_0 = arith.constant 0 : i32
    return %arg0, %c0_i32 : i32, i32
  }
}

</mosaic_0001>

<bundles_post_ra>
// kernel: tpu_custom_call.1
= control target key start
LH: loop header
LB: loop body
LE: loop exit
PB: predicated region body
PF: predicated region fallthrough
CT: control target
= control target key end

     0   :  { %9 = vsyncpa [#allocation6], 0  ;;  %s174_s0 = inlined_call_operand.vmem [shape: f32[2], index: 0, kind: input, shape index: {}]   ;;  %s175_s1 = inlined_call_operand.<no memory space> [shape: f32[1], index: 1, kind: input, shape index: {}]   ;;  %s176_s2 = inlined_call_operand.hbm [shape: f32[2,8,128], index: 2, kind: input, shape index: {}]   ;;  %s177_s3 = inlined_call_operand.hbm [shape: f32[8,128], index: 3, kind: output, shape index: {}]  }
   0x1   :  { %10 = vsyncpa [#allocation4], 0 }
   0x2   :  { %11 = vsyncpa [#allocation5], 0  ;;  %s18_s14 = sshll.u32 %s174_s0, 4  ;;  %s19_s14 = int_to_ptr.vmem [resolvable:$true] %s18_s14 }
   0x3   :  { %s79_s15 = scalar_lea.vmem %s19_s14, 16  ;;  %p84_p1 = scmp.lt.s32.totalorder %s19_s14, %s19_s14 }
   0x4   :  { %p80_p0 = scmp.ne.s32.totalorder %s19_s14, %s79_s15  ;;  %p85_p2 = scmp.lt.s32.totalorder %s79_s15, %s79_s15 }
   0x6   :  { %p86_p3 = por %p85_p2, %p84_p1 }
   0x8   :  { %p87_p4 = pnand %p86_p3, %p80_p0 }
   0xa   :  { %90 = shalt.err (!%p87_p4)
}
   0xb   :  { %s137_s16 = smov [#allocation3]   ;;  %s138_s17 = smov [#allocation7]  }
   0xc   :  { %21 = dma.vmem_to_smem %s19_s14, 16, %s137_s16, [#allocation6]  }
   0xd   :  { %s29_s18 = sshll.u32 %s138_s17, 4  ;;  %s30_s18 = int_to_ptr.vmem [resolvable:$true] %s29_s18 }
   0xe   :  { %s99_s19 = scalar_lea.vmem %s30_s18, 256  ;;  %p104_p6 = scmp.lt.s32.totalorder %s30_s18, %s30_s18 }
   0xf   :  { %p100_p5 = scmp.ne.s32.totalorder %s30_s18, %s99_s19  ;;  %p105_p7 = scmp.lt.s32.totalorder %s99_s19, %s99_s19 }
  0x11   :  { %p106_p8 = por %p105_p7, %p104_p6 }
  0x13   :  { %p107_p9 = pnand %p106_p8, %p100_p5 }
  0x15   :  { %110 = shalt.err (!%p107_p9)
}
  0x16   :  { %s139_s0 = smov 128   ;;  %s140_s20 = smov 8  }
  0x17   :  { %35 = dma.hbm_to_vmem [thread:$0]  %s176_s2, 256, %s30_s18, [#allocation4], %s139_s0, %s139_s0, %s140_s20  }
  0x18   :  { %131 = dma.done.wait [#allocation6], 16  }
  0x19   :  { %132 = vsyncadd [#allocation6], 4294967280 }
  0x1a   :  { %133 = dma.done.wait [#allocation4], 256  }
  0x1b   :  { %134 = vsyncadd [#allocation4], 4294967040 }
  0x1c   :  { %42 = sfence }
  0x1d   :  { %s44_s23 = sld [smem:[#allocation3]]  ;;  %v43_v0 = vld [vmem:[#allocation7] sm:$0xff]  ;;  %v48_v1 = vld [vmem:[#allocation7 + $0x8] sm:$0xff]  ;;  %v54_v6 = vstv %s175_s1  ;;  %s141_s27 = smov [#allocation8]  }
  0x1e   :  { %s73_s24 = sld [smem:[#allocation3 + $0x1]]  ;;  %s63_s28 = sshll.u32 %s141_s27, 4  ;;  %s64_s28 = int_to_ptr.vmem [resolvable:$true] %s63_s28 }
  0x1f   :  { %s111_s2 = scalar_lea.vmem %s64_s28, 128  ;;  %p116_p11 = scmp.lt.s32.totalorder %s64_s28, %s64_s28 }
  0x20   :  { %p112_p10 = scmp.ne.s32.totalorder %s64_s28, %s111_s2  ;;  %p117_p12 = scmp.lt.s32.totalorder %s111_s2, %s111_s2 }
  0x22   :  { %p118_p13 = por %p117_p12, %p116_p11 }
  0x23   :  { %v45_v2 = vstv %s44_s23 }
  0x24   :  { %v46_v3 = vmul.f32 %v45_v2, %v43_v0  ;;  %v50_v4 = vstv %s73_s24  ;;  %p119_p0 = pnand %p118_p13, %p112_p10 }
  0x25   :  { %v51_v5 = vmul.f32 %v50_v4, %v48_v1 }
  0x27   :  { %v52_v7 = vadd.f32 %v51_v5, %v46_v3 }
  0x29   :  { %v55_v8 = vadd.f32 %v54_v6, %v52_v7 }
  0x2b   :  { %56 = vst [vmem:[#allocation8] sm:$0xff] %v55_v8 }
  0x2c   :  { %122 = shalt.err (!%p119_p0)
}
  0x2d   :  { %66 = dma.vmem_to_hbm [thread:$0]  %s64_s28, 128, %s177_s3, [#allocation5]  }
  0x2e   :  { %135 = dma.done.wait [#allocation5], 128  }
  0x2f   :  { %136 = vsyncadd [#allocation5], 4294967168 }
  0x30   :  { %70 = vsyncpa [#allocation4], 1 }
  0x31   :  { %71 = vsyncpa [#allocation5], 1 }
  0x32   :  { %72 = vsyncpa [#allocation6], 1 }

</bundles_post_ra>
